<compile_context>
chip_gen: v5e
topology: v5e:2x2
jax: 0.10.0
libtpu: 0.0.40
codegen_flags: <defaults>
</compile_context>

<pallas_src>
import jax
import jax.numpy as jnp
from jax import lax
from jax.experimental import pallas as pl
from jax.experimental.pallas import tpu as pltpu


# --------------------------------------------------------------------------------------
# Kernel
# --------------------------------------------------------------------------------------
def _make_kernel(*, l_tile, n_l, l_orig, direct_acc, unroll):
    """Build the CrossMerge kernel body.

    Refs per grid step (b, d, k):
      yf_ref : (1, 1, d_tile, L)  forward-scan slice  ys[b, k]
      yb_ref : (1, 1, d_tile, L)  reverse-scan slice  ys[b, k + K/2]
      idx_ref: (1, 1, 1, L)       int32 gather targets for direction k
      out_ref: (1, d_tile, L)     output block, resident across the k axis
      scratch: (d_tile, L) f32    only when the output dtype is not f32
    """

    def kernel(yf_ref, yb_ref, idx_ref, out_ref, *scratch):
        k = pl.program_id(2)
        L = yf_ref.shape[3]

        acc_ref = out_ref if direct_acc else scratch[0]

        @pl.when(k == 0)
        def _init():
            acc_ref[...] = jnp.zeros_like(acc_ref)

        # Source-row index j (hoisted: small (L,1) iota).  The flip(-1) of the reverse
        # scan is folded here: (L_orig-1-j == tgt)  <=>  j == L_orig-1-tgt.
        row_ids = lax.broadcasted_iota(jnp.int32, (L, 1), 0)      # (L, 1)
        rev_row_ids = (l_orig - 1) - row_ids                      # (L, 1)

        def body(lt, carry):
            start = pl.multiple_of(lt * l_tile, 128)
            sl = pl.ds(start, l_tile)

            y_f = yf_ref[0, 0]                                    # (d_tile, L), native dtype
            y_b = yb_ref[0, 0]                                    # (d_tile, L)
            tgt = idx_ref[0, 0, :, sl]                            # (1, l_tile) int32

            # One-hot permutation tiles in ys' native dtype (0/1 exact in bf16/f32).
            oh_f = (row_ids == tgt).astype(y_f.dtype)             # (L, l_tile)
            oh_b = (rev_row_ids == tgt).astype(y_b.dtype)         # (L, l_tile)

            contrib = jnp.dot(y_f, oh_f, preferred_element_type=jnp.float32)
            contrib = contrib + jnp.dot(y_b, oh_b, preferred_element_type=jnp.float32)

            if direct_acc:
                out_ref[0, :, sl] = out_ref[0, :, sl] + contrib
            else:
                acc_ref[:, sl] = acc_ref[:, sl] + contrib
            return carry

        lax.fori_loop(0, n_l, body, 0, unroll=unroll)

        if not direct_acc:
            @pl.when(k == pl.num_programs(2) - 1)
            def _finalize():
                out_ref[0] = acc_ref[...].astype(out_ref.dtype)

    return kernel


# --------------------------------------------------------------------------------------
# Wrapper
# --------------------------------------------------------------------------------------
def _round_up(x, m):
    return ((x + m - 1) // m) * m


def _pick_tile(total, max_tile, align, prefer=None):
    """Largest divisor of `total` <= max_tile that is a multiple of `align`.

    `total` is guaranteed (by padding) to be a multiple of `align`, so this always
    succeeds.  When `prefer` is given, multiples of `prefer` are tried first.
    """
    max_tile = max(align, min(max_tile, total))
    if prefer is not None and prefer > align:
        start = max_tile - max_tile % prefer
        for t in range(start, 0, -prefer):
            if total % t == 0:
                return t
    start = max_tile - max_tile % align
    for t in range(start, 0, -align):
        if total % t == 0:
            return t
    return total


def cross_merge(ys, vec_indices, *, d_tile_max=512, l_tile_max=256):
    """Pallas implementation of CrossMerge.forward.

    ys:          (B, K, D, H, W) float (f32 or bf16), K even
    vec_indices: (B, H*W, K//2) integer
    returns:     (B, D, H*W)
    """
    B, K, D, H, W = ys.shape
    L = H * W
    k_half = K // 2
    assert k_half >= 1 and K == 2 * k_half, "CrossMerge requires an even K >= 2"

    out_dtype = ys.dtype
    in_isz = int(jnp.dtype(ys.dtype).itemsize)
    out_isz = in_isz
    direct_acc = jnp.dtype(out_dtype) == jnp.dtype(jnp.float32)

    # --- index preprocessing (glue, mirrors torch.argsort) ---------------------------
    idx = jnp.argsort(vec_indices, axis=1).transpose(0, 2, 1).astype(jnp.int32)  # (B, k_half, L)

    # --- pad to hardware-friendly shapes (lane-dense L, sublane-aligned D) -----------
    L_pad = _round_up(L, 128)
    D_pad = _round_up(D, 8)
    ys_flat = ys.reshape(B, K, D, L)
    if D_pad != D or L_pad != L:
        ys_flat = jnp.pad(ys_flat, ((0, 0), (0, 0), (0, D_pad - D), (0, L_pad - L)))
    if L_pad != L:
        # Padded targets point past every source row -> all-zero one-hot columns,
        # so the padded output columns are exactly zero and get sliced off below.
        idx = jnp.pad(idx, ((0, 0), (0, 0), (0, L_pad - L)), constant_values=L_pad)
    idx = idx.reshape(B, k_half, 1, L_pad)                                        # lane-dense

    # --- per-generation VMEM budget (v5e/v6e: 128 MiB, v7x: 64 MiB) -------------------
    try:
        vmem_cap = int(pltpu.get_tpu_info().vmem_capacity_bytes)
    except Exception:
        vmem_cap = 64 * 1024 * 1024  # conservative fallback (v7x-sized)
    vmem_budget = int(vmem_cap * 0.9)

    # --- tiling ------------------------------------------------------------------------
    d_tile = _pick_tile(D_pad, d_tile_max, align=8, prefer=128)   # matmul M dim
    l_tile = _pick_tile(L_pad, l_tile_max, align=128)             # matmul N dim (one MXU tile)
    unroll_est = 2

    def est(dt, lt):
        e = 2 * 2 * dt * L_pad * in_isz               # fwd + bwd y slices, double-buffered
        e += 2 * dt * L_pad * out_isz                 # output block, double-buffered
        if not direct_acc:
            e += dt * L_pad * 4                       # f32 scratch accumulator
        e += 2 * 4 * L_pad                            # idx row (int32), double-buffered
        e += 2 * unroll_est * L_pad * lt * in_isz     # live one-hot transients (<=2 per dir)
        e += unroll_est * dt * lt * 4                 # per-tile f32 matmul results
        return e

    while est(d_tile, l_tile) > vmem_budget:
        if d_tile > 8:
            nd = _pick_tile(D_pad, max(8, d_tile // 2), align=8, prefer=128)
            if nd < d_tile:
                d_tile = nd
                continue
        if l_tile > 128:
            nl = _pick_tile(L_pad, max(128, l_tile // 2), align=128)
            if nl < l_tile:
                l_tile = nl
                continue
        break

    # Guarantee >=2 parallel grid units so both v7x TensorCores get work.
    if B * (D_pad // d_tile) < 2 and D_pad >= 16:
        d_tile = _pick_tile(D_pad, max(8, D_pad // 2), align=8, prefer=128)

    n_d = D_pad // d_tile
    n_l = L_pad // l_tile
    unroll = 2 if n_l >= 2 else 1
    grid = (B, n_d, k_half)                           # k (scan-direction pair) = reduction axis

    vmem_limit = int(min(vmem_budget, max(2 * est(d_tile, l_tile), 32 * 1024 * 1024)))

    # One-hot matmul does L MACs per output element -> FLOPs >> bytes; tell XLA.
    flops = 2 * B * K * D_pad * L_pad * L_pad
    bytes_accessed = (ys_flat.size * in_isz + idx.size * 4 * n_d
                      + B * D_pad * L_pad * out_isz)
    cost = pl.CostEstimate(flops=int(flops), transcendentals=0,
                           bytes_accessed=int(bytes_accessed))

    kernel = _make_kernel(l_tile=l_tile, n_l=n_l, l_orig=L,
                          direct_acc=direct_acc, unroll=unroll)
    scratch_shapes = [] if direct_acc else [pltpu.VMEM((d_tile, L_pad), jnp.float32)]

    out = pl.pallas_call(
        kernel,
        out_shape=jax.ShapeDtypeStruct((B, D_pad, L_pad), out_dtype),
        grid_spec=pltpu.PrefetchScalarGridSpec(
            num_scalar_prefetch=0,
            grid=grid,
            in_specs=[
                # Forward-scan slice ys[b, k] and reverse-scan slice ys[b, k + K/2]:
                # same input array, two index maps -> the direction pair is fused into
                # one reduction step.
                pl.BlockSpec((1, 1, d_tile, L_pad), lambda b, d, k: (b, k, d, 0)),
                pl.BlockSpec((1, 1, d_tile, L_pad), lambda b, d, k: (b, k + k_half, d, 0)),
                pl.BlockSpec((1, 1, 1, L_pad), lambda b, d, k: (b, k, 0, 0)),
            ],
            # Output block index is constant across k -> resident accumulator target,
            # written back once per (b, d) as a fully lane-dense (d_tile, L) store.
            out_specs=pl.BlockSpec((1, d_tile, L_pad), lambda b, d, k: (b, d, 0)),
            scratch_shapes=scratch_shapes,
        ),
        compiler_params=pltpu.CompilerParams(
            dimension_semantics=("parallel", "parallel", "arbitrary"),
            vmem_limit_bytes=vmem_limit,
        ),
        cost_estimate=cost,
    )(ys_flat, ys_flat, idx)

    if D_pad != D or L_pad != L:
        out = out[:, :D, :L]
    return out


# --------------------------------------------------------------------------------------
# Pure-JAX reference (mirrors PyTorch semantics exactly)
# --------------------------------------------------------------------------------------
def _cross_merge_ref(ys, vec_indices):
    B, K, D, H, W = ys.shape
    L = H * W
    k_half = K // 2
    idx = jnp.argsort(vec_indices, axis=1).transpose(0, 2, 1)        # (B, k_half, L)
    idx_b = idx[:, :, None, :]                                       # (B, k_half, 1, L)
    ys_flat = ys.reshape(B, K, D, L)
    fwd = jnp.take_along_axis(ys_flat[:, :k_half], idx_b, axis=-1)
    bwd = jnp.take_along_axis(ys_flat[:, k_half:][..., ::-1], idx_b, axis=-1)
    return (fwd + bwd).sum(axis=1)


# --------------------------------------------------------------------------------------
# Self-test
# --------------------------------------------------------------------------------------
if __name__ == "__main__":
    def make_inputs(key, B, K, D, H, W, dtype=jnp.float32):
        L = H * W
        kh = K // 2
        k_ys, k_perm = jax.random.split(key)
        ys = jax.random.normal(k_ys, (B, K, D, H, W), dtype=jnp.float32).astype(dtype)
        perm_keys = jax.random.split(k_perm, B * kh)
        perms = jnp.stack([jax.random.permutation(pk, L) for pk in perm_keys])  # (B*kh, L)
        vec_indices = perms.reshape(B, kh, L).transpose(0, 2, 1).astype(jnp.int32)
        return ys, vec_indices

    key = jax.random.PRNGKey(0)
    k1, k2 = jax.random.split(key)

    # Test 1: f32 path — exercises D tiling (n_d=2), in-kernel L-tile fori_loop (n_l=2,
    # unroll=2), fused forward/reverse pair, and direct accumulation into out_ref.
    B, K, D, H, W = 2, 4, 16, 16, 16
    ys, vi = make_inputs(k1, B, K, D, H, W)
    out = jax.block_until_ready(cross_merge(ys, vi, d_tile_max=8, l_tile_max=128))
    ref = _cross_merge_ref(ys, vi)
    assert out.shape == (B, D, H * W), f"bad shape {out.shape}"
    assert jnp.allclose(out, ref, atol=1e-5, rtol=1e-5), "Pallas f32 result != reference"

    # Test 2: bf16 path — native-dtype operands + bf16 one-hot on the MXU, f32 VMEM
    # scratch accumulator with last-k cast/store.
    out_bf = jax.block_until_ready(
        cross_merge(ys.astype(jnp.bfloat16), vi, d_tile_max=8, l_tile_max=128))
    assert jnp.allclose(out_bf.astype(jnp.float32), ref, atol=1e-1, rtol=5e-2), \
        "Pallas bf16 result != reference (beyond bf16 tolerance)"

    # Test 3: unaligned L (10*10=100 -> padded to 128) and B=1 (forces the D split so
    # both TensorCores would get work); default tile sizes.
    B3, K3, D3, H3, W3 = 1, 2, 16, 10, 10
    ys3, vi3 = make_inputs(k2, B3, K3, D3, H3, W3)
    out3 = jax.block_until_ready(cross_merge(ys3, vi3))
    ref3 = _cross_merge_ref(ys3, vi3)
    assert out3.shape == (B3, D3, H3 * W3), f"bad shape {out3.shape}"
    assert jnp.allclose(out3, ref3, atol=1e-5, rtol=1e-5), "Pallas padded-L result != reference"

    print("KERNEL_OK")
</pallas_src>

<mosaic_0001>
module attributes {stable_mosaic.version = 11 : i64} {
  func.func @kernel(%arg0: i32, %arg1: i32, %arg2: i32, %arg3: memref<1x1x8x256xf32, #tpu.memory_space<vmem>>, %arg4: memref<1x1x8x256xf32, #tpu.memory_space<vmem>>, %arg5: memref<1x1x1x256xi32, #tpu.memory_space<vmem>>, %arg6: memref<1x8x256xf32, #tpu.memory_space<vmem>>) attributes {dimension_semantics = [#tpu.dimension_semantics<parallel>, #tpu.dimension_semantics<parallel>, #tpu.dimension_semantics<arbitrary>], iteration_bounds = array<i64: 2, 2, 2>, scalar_prefetch = 0 : i64, scratch_operands = 0 : i64, tpu.core_type = #tpu.core_type<tc>, window_params = [{transform_indices = @transform_0, window_bounds = array<i64: 1, 1, 8, 256>}, {transform_indices = @transform_1, window_bounds = array<i64: 1, 1, 8, 256>}, {transform_indices = @transform_2, window_bounds = array<i64: 1, 1, 1, 256>}, {transform_indices = @transform_3, window_bounds = array<i64: 1, 8, 256>}]} {
    %c0_i32 = arith.constant 0 : i32
    %0 = arith.cmpi eq, %arg2, %c0_i32 : i32
    %1 = arith.extui %0 : i1 to i32
    %c0_i32_0 = arith.constant 0 : i32
    %2 = arith.cmpi ne, %1, %c0_i32_0 : i32
    scf.if %2 {
      %cst_35 = arith.constant 0.000000e+00 : f32
      %66 = vector.broadcast %cst_35 : f32 to vector<1x8x256xf32>
      %c0_36 = arith.constant 0 : index
      %c0_37 = arith.constant 0 : index
      %c0_38 = arith.constant 0 : index
      %67 = vector.load %arg6[%c0_36, %c0_37, %c0_38] : memref<1x8x256xf32, #tpu.memory_space<vmem>>, vector<1x8x256xf32>
      tpu.vector_store %arg6[%c0_36, %c0_37, %c0_38], %66 {strides = array<i32>} : memref<1x8x256xf32, #tpu.memory_space<vmem>>, vector<1x8x256xf32>,
    } else {
    }
    %3 = tpu.iota {dimensions = array<i32: 0>} : vector<256x1xi32>
    %c255_i32 = arith.constant 255 : i32
    %4 = vector.broadcast %c255_i32 : i32 to vector<256x1xi32>
    %5 = arith.subi %4, %3 : vector<256x1xi32>
    %c0_i32_1 = arith.constant 0 : i32
    %c128_i32 = arith.constant 128 : i32
    %6 = arith.muli %c0_i32_1, %c128_i32 : i32
    %7 = tpu.assume_multiple %6, 128 : i32
    %c0 = arith.constant 0 : index
    %c0_2 = arith.constant 0 : index
    %c0_3 = arith.constant 0 : index
    %c0_4 = arith.constant 0 : index
    %8 = vector.load %arg3[%c0, %c0_2, %c0_3, %c0_4] : memref<1x1x8x256xf32, #tpu.memory_space<vmem>>, vector<1x1x8x256xf32>
    %9 = vector.shape_cast %8 : vector<1x1x8x256xf32> to vector<8x256xf32>
    %c0_5 = arith.constant 0 : index
    %c0_6 = arith.constant 0 : index
    %c0_7 = arith.constant 0 : index
    %c0_8 = arith.constant 0 : index
    %10 = vector.load %arg4[%c0_5, %c0_6, %c0_7, %c0_8] : memref<1x1x8x256xf32, #tpu.memory_space<vmem>>, vector<1x1x8x256xf32>
    %11 = vector.shape_cast %10 : vector<1x1x8x256xf32> to vector<8x256xf32>
    %c0_9 = arith.constant 0 : index
    %c0_10 = arith.constant 0 : index
    %c0_11 = arith.constant 0 : index
    %12 = arith.index_cast %7 : i32 to index
    %13 = vector.load %arg5[%c0_9, %c0_10, %c0_11, %12] : memref<1x1x1x256xi32, #tpu.memory_space<vmem>>, vector<1x1x1x128xi32>
    %14 = vector.shape_cast %13 : vector<1x1x1x128xi32> to vector<1x128xi32>
    %15 = vector.broadcast %3 : vector<256x1xi32> to vector<256x128xi32>
    %16 = vector.broadcast %14 : vector<1x128xi32> to vector<256x128xi32>
    %17 = arith.cmpi eq, %15, %16 : vector<256x128xi32>
    %18 = arith.extui %17 : vector<256x128xi1> to vector<256x128xi32>
    %19 = arith.sitofp %18 : vector<256x128xi32> to vector<256x128xf32>
    %20 = vector.broadcast %5 : vector<256x1xi32> to vector<256x128xi32>
    %21 = vector.broadcast %14 : vector<1x128xi32> to vector<256x128xi32>
    %22 = arith.cmpi eq, %20, %21 : vector<256x128xi32>
    %23 = arith.extui %22 : vector<256x128xi1> to vector<256x128xi32>
    %24 = arith.sitofp %23 : vector<256x128xi32> to vector<256x128xf32>
    %cst = arith.constant dense<0.000000e+00> : vector<8x128xf32>
    %25 = tpu.matmul %9, %19, %cst {dimension_numbers = #tpu.dot_dimension_numbers<[1], [0], [0], [1], [0, 0, 1, 1], [], []>} : vector<8x256xf32>, vector<256x128xf32>, vector<8x128xf32> -> vector<8x128xf32>
    %cst_12 = arith.constant dense<0.000000e+00> : vector<8x128xf32>
    %26 = tpu.matmul %11, %24, %cst_12 {dimension_numbers = #tpu.dot_dimension_numbers<[1], [0], [0], [1], [0, 0, 1, 1], [], []>} : vector<8x256xf32>, vector<256x128xf32>, vector<8x128xf32> -> vector<8x128xf32>
    %27 = arith.addf %25, %26 : vector<8x128xf32>
    %c0_13 = arith.constant 0 : index
    %c0_14 = arith.constant 0 : index
    %28 = arith.index_cast %7 : i32 to index
    %29 = vector.load %arg6[%c0_13, %c0_14, %28] : memref<1x8x256xf32, #tpu.memory_space<vmem>>, vector<1x8x128xf32>
    %30 = vector.shape_cast %29 : vector<1x8x128xf32> to vector<8x128xf32>
    %31 = arith.addf %30, %27 : vector<8x128xf32>
    %c0_15 = arith.constant 0 : index
    %c0_16 = arith.constant 0 : index
    %32 = arith.index_cast %7 : i32 to index
    %33 = vector.load %arg6[%c0_15, %c0_16, %32] : memref<1x8x256xf32, #tpu.memory_space<vmem>>, vector<1x8x128xf32>
    %34 = vector.shape_cast %33 : vector<1x8x128xf32> to vector<8x128xf32>
    %35 = vector.shape_cast %31 : vector<8x128xf32> to vector<1x8x128xf32>
    tpu.vector_store %arg6[%c0_15, %c0_16, %32], %35 {strides = array<i32>} : memref<1x8x256xf32, #tpu.memory_space<vmem>>, vector<1x8x128xf32>,
    %c1_i32 = arith.constant 1 : i32
    %c128_i32_17 = arith.constant 128 : i32
    %36 = arith.muli %c1_i32, %c128_i32_17 : i32
    %37 = tpu.assume_multiple %36, 128 : i32
    %c0_18 = arith.constant 0 : index
    %c0_19 = arith.constant 0 : index
    %c0_20 = arith.constant 0 : index
    %c0_21 = arith.constant 0 : index
    %38 = vector.load %arg3[%c0_18, %c0_19, %c0_20, %c0_21] : memref<1x1x8x256xf32, #tpu.memory_space<vmem>>, vector<1x1x8x256xf32>
    %39 = vector.shape_cast %38 : vector<1x1x8x256xf32> to vector<8x256xf32>
    %c0_22 = arith.constant 0 : index
    %c0_23 = arith.constant 0 : index
    %c0_24 = arith.constant 0 : index
    %c0_25 = arith.constant 0 : index
    %40 = vector.load %arg4[%c0_22, %c0_23, %c0_24, %c0_25] : memref<1x1x8x256xf32, #tpu.memory_space<vmem>>, vector<1x1x8x256xf32>
    %41 = vector.shape_cast %40 : vector<1x1x8x256xf32> to vector<8x256xf32>
    %c0_26 = arith.constant 0 : index
    %c0_27 = arith.constant 0 : index
    %c0_28 = arith.constant 0 : index
    %42 = arith.index_cast %37 : i32 to index
    %43 = vector.load %arg5[%c0_26, %c0_27, %c0_28, %42] : memref<1x1x1x256xi32, #tpu.memory_space<vmem>>, vector<1x1x1x128xi32>
    %44 = vector.shape_cast %43 : vector<1x1x1x128xi32> to vector<1x128xi32>
    %45 = vector.broadcast %3 : vector<256x1xi32> to vector<256x128xi32>
    %46 = vector.broadcast %44 : vector<1x128xi32> to vector<256x128xi32>
    %47 = arith.cmpi eq, %45, %46 : vector<256x128xi32>
    %48 = arith.extui %47 : vector<256x128xi1> to vector<256x128xi32>
    %49 = arith.sitofp %48 : vector<256x128xi32> to vector<256x128xf32>
    %50 = vector.broadcast %5 : vector<256x1xi32> to vector<256x128xi32>
    %51 = vector.broadcast %44 : vector<1x128xi32> to vector<256x128xi32>
    %52 = arith.cmpi eq, %50, %51 : vector<256x128xi32>
    %53 = arith.extui %52 : vector<256x128xi1> to vector<256x128xi32>
    %54 = arith.sitofp %53 : vector<256x128xi32> to vector<256x128xf32>
    %cst_29 = arith.constant dense<0.000000e+00> : vector<8x128xf32>
    %55 = tpu.matmul %39, %49, %cst_29 {dimension_numbers = #tpu.dot_dimension_numbers<[1], [0], [0], [1], [0, 0, 1, 1], [], []>} : vector<8x256xf32>, vector<256x128xf32>, vector<8x128xf32> -> vector<8x128xf32>
    %cst_30 = arith.constant dense<0.000000e+00> : vector<8x128xf32>
    %56 = tpu.matmul %41, %54, %cst_30 {dimension_numbers = #tpu.dot_dimension_numbers<[1], [0], [0], [1], [0, 0, 1, 1], [], []>} : vector<8x256xf32>, vector<256x128xf32>, vector<8x128xf32> -> vector<8x128xf32>
    %57 = arith.addf %55, %56 : vector<8x128xf32>
    %c0_31 = arith.constant 0 : index
    %c0_32 = arith.constant 0 : index
    %58 = arith.index_cast %37 : i32 to index
    %59 = vector.load %arg6[%c0_31, %c0_32, %58] : memref<1x8x256xf32, #tpu.memory_space<vmem>>, vector<1x8x128xf32>
    %60 = vector.shape_cast %59 : vector<1x8x128xf32> to vector<8x128xf32>
    %61 = arith.addf %60, %57 : vector<8x128xf32>
    %c0_33 = arith.constant 0 : index
    %c0_34 = arith.constant 0 : index
    %62 = arith.index_cast %37 : i32 to index
    %63 = vector.load %arg6[%c0_33, %c0_34, %62] : memref<1x8x256xf32, #tpu.memory_space<vmem>>, vector<1x8x128xf32>
    %64 = vector.shape_cast %63 : vector<1x8x128xf32> to vector<8x128xf32>
    %65 = vector.shape_cast %61 : vector<8x128xf32> to vector<1x8x128xf32>
    tpu.vector_store %arg6[%c0_33, %c0_34, %62], %65 {strides = array<i32>} : memref<1x8x256xf32, #tpu.memory_space<vmem>>, vector<1x8x128xf32>,
    %c2_i32 = arith.constant 2 : i32
    return
  }
  func.func @transform_0(%arg0: i32, %arg1: i32, %arg2: i32) -> (i32, i32, i32, i32) {
    %c0_i32 = arith.constant 0 : i32
    %c0_i32_0 = arith.constant 0 : i32
    return %arg0, %arg2, %arg1, %c0_i32 : i32, i32, i32, i32
  }
  func.func @transform_1(%arg0: i32, %arg1: i32, %arg2: i32) -> (i32, i32, i32, i32) {
    %c2_i32 = arith.constant 2 : i32
    %0 = arith.addi %arg2, %c2_i32 : i32
    %c0_i32 = arith.constant 0 : i32
    %c0_i32_0 = arith.constant 0 : i32
    return %arg0, %0, %arg1, %c0_i32 : i32, i32, i32, i32
  }
  func.func @transform_2(%arg0: i32, %arg1: i32, %arg2: i32) -> (i32, i32, i32, i32) {
    %c0_i32 = arith.constant 0 : i32
    %c0_i32_0 = arith.constant 0 : i32
    %c0_i32_1 = arith.constant 0 : i32
    return %arg0, %arg2, %c0_i32, %c0_i32_0 : i32, i32, i32, i32
  }
  func.func @transform_3(%arg0: i32, %arg1: i32, %arg2: i32) -> (i32, i32, i32) {
    %c0_i32 = arith.constant 0 : i32
    %c0_i32_0 = arith.constant 0 : i32
    return %arg0, %arg1, %c0_i32 : i32, i32, i32
  }
}

</mosaic_0001>

<bundles_post_ra>
// kernel: tpu_custom_call.1
= control target key start
LH: loop header
LB: loop body
LE: loop exit
PB: predicated region body
PF: predicated region fallthrough
CT: control target
= control target key end

     0   :  { %s2980_s0 = inlined_call_operand.hbm [shape: f32[2,4,16,256], index: 0, kind: input, shape index: {}]   ;;  %s2981_s1 = inlined_call_operand.hbm [shape: f32[2,4,16,256], index: 1, kind: input, shape index: {}]   ;;  %s2982_s2 = inlined_call_operand.hbm [shape: s32[2,2,1,256], index: 2, kind: input, shape index: {}]   ;;  %s2983_s3 = inlined_call_operand.hbm [shape: f32[2,16,256], index: 3, kind: output, shape index: {}]  }
   0x1   :  { %2998 = sst [smem:[#allocation26_spill]] %s2980_s0 }
   0x2   :  { %2999 = sst [smem:[#allocation27_spill]] %s2981_s1 }
   0x3   :  { %3000 = sst [smem:[#allocation28_spill]] %s2982_s2 }
   0x4   :  { %3001 = sst [smem:[#allocation29_spill]] %s2983_s3 }
   0x5   :  { %8 = vsyncpa [#allocation3], 0 }
   0x6   :  { %10 = vsyncpa [#allocation3 + $0x1], 0 }
   0x7   :  { %11 = vsyncpa [#allocation6], 0 }
   0x8   :  { %13 = vsyncpa [#allocation6 + $0x1], 0 }
   0x9   :  { %14 = vsyncpa [#allocation4], 0 }
   0xa   :  { %16 = vsyncpa [#allocation4 + $0x1], 0  ;;  %s1886_s12 = smov 0   ;;  %s1888_s13 = smov 0  }
   0xb   :  { %s1890_s14 = smov 0   ;;  %s1892_s15 = smov 0  }
   0xc   :  { %s1894_s16 = smov 0   ;;  %s1896_s17 = smov 0  }
   0xd   :  { %s1898_s18 = smov 0   ;;  %s1900_s19 = smov 0  }
   0xe   :  { %s1902_s20 = smov 0   ;;  %s1904_s21 = smov 0  }
   0xf   :  { %s1906_s22 = smov 0   ;;  %s1908_s23 = smov 0  }
  0x10   :  { %s1910_s24 = smov 0   ;;  %s1912_s25 = smov 0  }
  0x11   :  { %s1914_s26 = smov 0   ;;  %s1916_s27 = smov 0  }
  0x12   :  { %s1918_s28 = smov 0   ;;  %s1920_s29 = smov 0  }
  0x13   :  { %s1922_s30 = smov 0  }
  0x14 LB: > { %3002 = sst [smem:[#allocation13_spill]] %s1790_s12  ;;  %s1982_s4 = sadd.s32 4294967295, %s1862_s30   ;;  %s1862_s30 = sphi %s1922_s30, %s22_s30   ;;  %s1858_s29 = sphi %s1920_s29, %s3089_s29   ;;  %s1854_s28 = sphi %s1918_s28, %s3075_s28   ;;  %s1850_s27 = sphi %s1916_s27, %s3088_s27   ;;  %s1846_s26 = sphi %s1914_s26, %s3087_s26   ;;  %s1842_s25 = sphi %s1912_s25, %s3072_s25   ;;  %s1838_s24 = sphi %s1910_s24, %s3086_s24   ;;  %s1834_s23 = sphi %s1908_s23, %s3085_s23   ;;  %s1830_s22 = sphi %s1906_s22, %s3084_s22   ;;  %s1826_s21 = sphi %s1904_s21, %s3083_s21   ;;  %s1822_s20 = sphi %s1902_s20, %s3082_s20   ;;  %s1818_s19 = sphi %s1900_s19, %s3081_s19   ;;  %s1814_s18 = sphi %s1898_s18, %s3070_s18   ;;  %s1810_s17 = sphi %s1896_s17, %s3080_s17   ;;  %s1806_s16 = sphi %s1894_s16, %s3079_s16   ;;  %s1802_s15 = sphi %s1892_s15, %s3078_s15   ;;  %s1798_s14 = sphi %s1890_s14, %s3069_s14   ;;  %s1794_s13 = sphi %s1888_s13, %s3076_s13   ;;  %s1790_s12 = sphi %s1886_s12, %s3074_s12  }
  0x15   : > { %3003 = sst [smem:[#allocation14_spill]] %s1798_s14  ;;  %s34_s6 = sadd.s32 1, %s1850_s27 }
  0x16   : > { %3004 = sst [smem:[#allocation15_spill]] %s1818_s19  ;;  %s37_s7 = sadd.s32 1, %s1854_s28 }
  0x17   : > { %3005 = sst [smem:[#allocation16_spill]] %s1838_s24  ;;  %p35_p0 = scmp.ge.s32.totalorder %s34_s6, 2 }
  0x18   : > { %3006 = sst [smem:[#allocation17_spill]] %s1842_s25  ;;  %s41_s8 = sadd.s32 1, %s1858_s29 }
  0x19   : > { %3007 = sst [smem:[#allocation18_spill]] %s1846_s26  ;;  %p60_p1 = scmp.eq.s32.totalorder %s1862_s30, 0 }
  0x1a   : > { %3008 = sst [smem:[#allocation19_spill]] %s1854_s28  ;;  %p66_p2 = scmp.eq.s32.totalorder %s1982_s4, 0 }
  0x1b   : > { %s3091_s6 = smov (%p35_p0, %s34_s6), 0  ;;  %s3093_s7 = smov (!%p35_p0, %s37_s7), %s1854_s28 }
  0x1c   : > { %3009 = sst [smem:[#allocation20_spill]] %s3091_s6  ;;  %s75_s9 = sadd.s32 2, %s1850_s27 }
  0x1d   : > { %s76_s10 = sadd.s32 2, %s3091_s6  ;;  %p39_p3 = scmp.ge.s32.totalorder %s3093_s7, 2 }
  0x1e   : > { %s78_s11 = ssub.s32 %s75_s9, %s76_s10  ;;  %s84_s5 = sadd.s32 1, %s1822_s20 }
  0x1f   : > { %p91_p4 = scmp.ne.s32.totalorder %s1822_s20, %s1818_s19  ;;  %s3095_s7 = smov (%p39_p3, %s3093_s7), 0 }
  0x20   : > { %3010 = sst [smem:[#allocation21_spill]] %s3095_s7  ;;  %s3097_s8 = smov (!%p39_p3, %s41_s8), %s1858_s29 }
  0x21   : > { %s2003_s3 = ssub.s32 %s1854_s28, %s3095_s7  ;;  %p2007_p5 = por %p91_p4, %p60_p1 }
  0x22   : > { %p43_p6 = scmp.ge.s32.totalorder %s3097_s8, 2  ;;  %p97_p7 = scmp.ne.s32.totalorder %s1818_s19, %s1814_s18 }
  0x23   : > { %s140_s9 = sadd.s32 1, %s1798_s14  ;;  %p150_p8 = scmp.ne.s32.totalorder %s1798_s14, %s1794_s13 }
  0x24   : > { %s3099_s8 = smov (%p43_p6, %s3097_s8), 0  ;;  %p2020_p9 = por %p97_p7, %p66_p2 }
  0x25   : > { %3012 = sst [smem:[#allocation22_spill]] %s3099_s8  ;;  %p151_p10 = scmp.eq.s32.totalorder %s1982_s4, 7 }
  0x26   : > { %s3013_s10 = scalar_select %p2020_p9, 1, 0 }
  0x27   : > { %s2027_s7 = ssub.s32 %s1858_s29, %s3099_s8  ;;  %p156_p11 = scmp.ne.s32.totalorder %s1794_s13, %s1790_s12 }
  0x28   : > { %3014 = sst [smem:[#allocation23_spill]] %s3013_s10  ;;  %s79_s18 = sor.u32 %s78_s11, %s2027_s7 }
  0x29   : > { %s137_s25 = sor.u32 %s2003_s3, %s2027_s7  ;;  %s81_s24 = sor.u32 %s79_s18, %s2003_s3 }
  0x2a   : > { %p138_p12 = scmp.eq.s32.totalorder %s137_s25, 0  ;;  %p82_p13 = scmp.eq.s32.totalorder %s81_s24, 0 }
  0x2b   : > { %p2035_p0 = por %p151_p10, %p150_p8  ;;  %s3018_s8 = sadd.s32 4294967294, %s1862_s30  }
  0x2c   : > { %s2040_s10 = scalar_select %p138_p12, %s1798_s14, %s140_s9  }
  0x2d   : > { %s2043_s2 = scalar_select %p82_p13, %s1822_s20, %s84_s5  }
  0x2e   : > { %3016 = sst [smem:[#allocation24_spill]] %s2040_s10  ;;  %p157_p3 = scmp.eq.s32.totalorder %s3018_s8, 7 }
  0x2f   : > { %3017 = sst [smem:[#allocation25_spill]] %s2043_s2  ;;  %p2993_p4 = scmp.lt.s32.totalorder %s1862_s30, 8 }
  0x30   : > { %s1115_s0 = sshll.u32 %s1854_s28, 1  ;;  %p2049_p6 = por %p157_p3, %p156_p11 }
  0x31   : > { %s1116_s25 = sshll.u32 %s1850_s27, 2  ;;  %s1117_s18 = sshll.u32 %s1858_s29, 4 }
  0x32   : > { %s3019_s11 = scalar_select %p2049_p6, 1, 0 }
  0x33   : > { %s186_s24 = sadd.s32 %s1116_s25, %s1115_s0  ;;  %s201_s5 = sand.u32 1, %s1862_s30  }
  0x34   : > { %s2055_s12 = sadd.s32 %s1117_s18, %s186_s24  ;;  %s203_s8 = sand.u32 1, %s1822_s20  }
  0x35   : > { %s1118_s9 = sshll.u32 %s2055_s12, 3  ;;  %s3020_s1 = sld [smem:[#allocation27_spill]] }
  0x36   : > { %s1119_s14 = sshll.u32 %s203_s8, 4  ;;  %p1410_p7 = pnand %p2993_p4, %p2007_p5 }
  0x37   : > { %s205_s24 = scalar_lea.vmem [#allocation5], %s1119_s14  ;;  %p1127_p8 = scmp.ge.s32.totalorder %s1862_s30, 1 }
  0x38   : > { %s219_s12 = sshll.u32 %s205_s24, 4  ;;  %p245_p10 = scmp.lt.s32.totalorder %s1862_s30, 9  ;;  %s220_s12 = int_to_ptr.vmem [resolvable:$true] %s219_s12 }
  0x39   : > { %s2069_s2 = scalar_lea.sflag [#allocation6], %s201_s5  ;;  %s46_s14 = ssub.s32 %s1850_s27, %s3091_s6 }
  0x3a   : > { %p2072_p11 = pnand %p1127_p8, %p245_p10  ;;  %s47_s18 = sor.u32 %s46_s14, %s2027_s7 }
  0x3b   : > { %s1010_s10 = scalar_lea.hbm %s3020_s1, %s1118_s9  ;;  %p59_p12 = scmp.ne.s32.totalorder %s1834_s23, %s1830_s22 }
  0x3c   : > { %s1011_s0 = scalar_lea.hbm %s1010_s10, 64  ;;  %s52_s10 = sadd.s32 1, %s1834_s23 }
  0x3d   : > { %s217_s25 = sshll.u32 %s1011_s0, 4  ;;  %s49_s26 = sor.u32 %s2003_s3, %s47_s18  ;;  %s218_s25 = int_to_ptr.hbm [resolvable:$true] %s217_s25 }
  0x3e   : > { %1412 = dma.hbm_to_vmem [thread:$0]  (!%p1410_p7), %s218_s25, 256, %s220_s12, %s2069_s2  }
  0x3f   : > { %p65_p13 = scmp.ne.s32.totalorder %s1830_s22, %s1826_s21  ;;  %p50_p3 = scmp.eq.s32.totalorder %s49_s26, 0 }
  0x40   : > { %p61_p5 = por %p60_p1, %p59_p12  ;;  %s177_s8 = sand.u32 1, %s1834_s23  }
  0x41   : > { %p2089_p4 = por %p66_p2, %p65_p13  ;;  %s1114_s3 = sshll.u32 %s177_s8, 4 }
  0x42   : > { %s2095_s7 = scalar_select %p50_p3, %s1834_s23, %s52_s10  }
  0x43   : > { %s3023_s25 = sld [smem:[#allocation26_spill]]  ;;  %s181_s14 = scalar_lea.vmem [#allocation2], %s1114_s3 }
  0x44   : > { %s194_s26 = sshll.u32 %s181_s14, 4  ;;  %p3024_p7 = scmp.lt.s32.totalorder %s1862_s30, 8  ;;  %s195_s26 = int_to_ptr.vmem [resolvable:$true] %s194_s26 }
  0x45   : > { %s178_s1 = scalar_lea.sflag [#allocation3], %s177_s8  ;;  %p110_p10 = scmp.eq.s32.totalorder %s47_s18, 0 }
  0x46   : > { %p1407_p8 = pnand %p3024_p7, %p61_p5  ;;  %s112_s10 = sadd.s32 1, %s1810_s17 }
  0x47   : > { %p119_p12 = scmp.ne.s32.totalorder %s1810_s17, %s1806_s16  ;;  %p125_p13 = scmp.ne.s32.totalorder %s1806_s16, %s1802_s15 }
  0x48   : > { %s2108_s21 = scalar_select %p110_p10, %s1810_s17, %s112_s10  }
  0x49   : > { %s190_s24 = scalar_lea.hbm %s3023_s25, %s1118_s9  ;;  %p2112_p3 = por %p119_p12, %p60_p1 }
  0x4a   : > { %s192_s12 = sshll.u32 %s190_s24, 4  ;;  %p2118_p6 = por %p125_p13, %p66_p2  ;;  %s193_s12 = int_to_ptr.hbm [resolvable:$true] %s192_s12 }
  0x4b   : > { %1409 = dma.hbm_to_vmem [thread:$0]  (!%p1407_p8), %s193_s12, 256, %s195_s26, %s178_s1  }
  0x4c   : > { %s228_s1 = sand.u32 1, %s1810_s17   ;;  %s1125_s18 = sshll.u32 %s1850_s27, 1 }
  0x4d   : > { %s1124_s8 = sshll.u32 %s228_s1, 1  ;;  %s1126_s0 = sshll.u32 %s1858_s29, 2 }
  0x4e   : > { %s235_s25 = sadd.s32 %s1126_s0, %s1125_s18  ;;  %s3027_s12 = sld [smem:[#allocation28_spill]] }
  0x4f   : > { %s230_s26 = scalar_lea.vmem [#allocation7], %s1124_s8  ;;  %p3028_p1 = pmov %p3024_p7 }
  0x50   : > { %s240_s10 = sshll.u32 %s230_s26, 4  ;;  %s251_s1 = sand.u32 (!%p2072_p11), 1, %s1830_s22   ;;  %s241_s10 = int_to_ptr.vmem [resolvable:$true] %s240_s10 }
  0x51   : > { %p1413_p2 = pnand %p3028_p1, %p2112_p3  ;;  %s2136_s18 = sshll.u32 (!%p2072_p11), %s251_s1, 4 }
  0x52   : > { %249 = sbr.rel (%p2072_p11) target bundleno = 331 (0x14b), region = 32  ;;  %s252_s0 = scalar_lea.sflag (!%p2072_p11), [#allocation3], %s251_s1 }
  0x54   : > { %s236_s14 = scalar_lea.hbm %s3027_s12, %s235_s25  ;;  %s255_s25 = scalar_lea.vmem (!%p2072_p11), [#allocation2], %s2136_s18 }
  0x55   : > { %s238_s6 = sshll.u32 %s236_s14, 4  ;;  %s239_s6 = int_to_ptr.hbm [resolvable:$true] %s238_s6 }
  0x56   : > { %1415 = dma.hbm_to_vmem [thread:$0]  (!%p1413_p2), %s239_s6, 32, %s241_s10, %s2069_s2  }
  0x57   : > { %1773 = dma.done.wait (%p2089_p4), %s252_s0, 256  }
  0x58   : > { %1775 = vsyncadd (%p2089_p4), %s252_s0, 4294967040  ;;  %s3029_s9 = sld [smem:[#allocation15_spill]]  ;;  %s261_s6 = sand.u32 1, %s1982_s4  }
  0x59   : > { %s262_s15 = scalar_lea.sflag [#allocation6], %s261_s6 }
  0x5e   : > { %s263_s2 = sand.u32 1, %s3029_s9  }
  0x5f   : > { %s2145_s28 = sshll.u32 %s263_s2, 4 }
  0x60   : > { %s265_s24 = scalar_lea.vmem [#allocation5], %s2145_s28 }
  0x61   : > { %1777 = dma.done.wait (%p2020_p9), %s262_s15, 256  }
  0x62   : > { %1779 = vsyncadd (%p2020_p9), %s262_s15, 4294967040  ;;  %s273_s12 = sand.u32 1, %s1806_s16  }
  0x63   : > { %s2153_s5 = sshll.u32 %s273_s12, 1 }
  0x64   : > { %s275_s14 = scalar_lea.vmem [#allocation7], %s2153_s5 }
  0x65   : > { %1781 = dma.done.wait (%p2118_p6), %s262_s15, 32  }
  0x66   : > { %1783 = vsyncadd (%p2118_p6), %s262_s15, 4294967264  ;;  %s306_s4 = sand.u32 1, %s1794_s13   ;;  %s3031_s1 = sld [smem:[#allocation16_spill]] }
  0x67   : > { %s1131_s26 = sshll.u32 %s306_s4, 4 }
  0x68   : > { %s2163_s10 = scalar_lea.vmem [#allocation8], %s1131_s26 }
  0x6c   : > { %p1132_p9 = scmp.ne.s32.totalorder %s3031_s1, 0 }
  0x6e   : > { %313 = sbr.rel (%p1132_p9) target bundleno = 118 (0x76), region = 48 }
  0x73   : > { %v1864_v0 = vmov 0.0  }
  0x74   : > { %314 = vst [vmem:[%s2163_s10] sm:$0xff] %v1864_v0 }
  0x75   : > { %315 = vst [vmem:[%s2163_s10 + $0x8] sm:$0xff] %v1864_v0 }
  0x76 PF: > { %v316_v1 = vlaneseq  ;;  %v2172_v3 = vld [vmem:[%s275_s14] ss:$0 sm:$0xff]  ;;  %v1865_v13 = vmov 1.0   ;;  %v2599_v56 = vld [vmem:[%s275_s14 + $0x1] ss:$0 sm:$0xff]  ;;  %s3061_s3 = sld [smem:[#allocation17_spill]] }
  0x77   : > { %s3062_s18 = sld [smem:[#allocation18_spill]]  ;;  %s946_s14 = scalar_lea.sflag [#allocation4], %s306_s4 }
  0x78   : > { %v2168_v2 = vshrl.u32 %v316_v1, 7  ;;  %s3063_s28 = sld [smem:[#allocation29_spill]] }
  0x7a   : > { %v2175_v4 = vadd.s32 120, %v2168_v2  ;;  %v2178_v5 = vadd.s32 112, %v2168_v2  ;;  %v2181_v6 = vadd.s32 248, %v2168_v2  ;;  %v2184_v7 = vadd.s32 104, %v2168_v2 }
  0x7b   : > { %v2187_v8 = vadd.s32 240, %v2168_v2  ;;  %v2190_v9 = vadd.s32 96, %v2168_v2  ;;  %v2193_v10 = vadd.s32 232, %v2168_v2  ;;  %v2196_v11 = vadd.s32 88, %v2168_v2 }
  0x7c   : > { %vm402_vm0 = vcmp.eq.s32.totalorder %v2175_v4, %v2172_v3  ;;  %vm401_vm1 = vcmp.eq.s32.totalorder %v2178_v5, %v2172_v3  ;;  %vm418_vm2 = vcmp.eq.s32.totalorder %v2181_v6, %v2172_v3  ;;  %v364_v12 = vsub.s32 255, %v2175_v4  ;;  %s1393_s0 = sshll.u32 %s3061_s3, 1 }
  0x7d   : > { %1229 = vmatpush.msk.msra.mxu2 %vm402_vm0, %v1865_v13  ;;  %1245 = vmatpush.msk.msra.mxu3 %vm418_vm2, %v1865_v13  ;;  %v380_v14 = vsub.s32 255, %v2181_v6  ;;  %vm400_vm3 = vcmp.eq.s32.totalorder %v2184_v7, %v2172_v3  ;;  %vm417_vm4 = vcmp.eq.s32.totalorder %v2187_v8, %v2172_v3  ;;  %v363_v15 = vsub.s32 255, %v2178_v5 }
  0x7e   : > { %vm498_vm5 = vcmp.eq.s32.totalorder %v364_v12, %v2172_v3  ;;  %v379_v16 = vsub.s32 255, %v2187_v8  ;;  %vm399_vm6 = vcmp.eq.s32.totalorder %v2190_v9, %v2172_v3  ;;  %vm416_vm7 = vcmp.eq.s32.totalorder %v2193_v10, %v2172_v3  ;;  %s3064_s5 = smov %s3063_s28 }
  0x7f   : > { %1230 = vmatpush.msk.msra.mxu2 %vm401_vm1, %v1865_v13  ;;  %1197 = vmatpush.msk.msra.mxu0 %vm498_vm5, %v1865_v13  ;;  %vm514_vm8 = vcmp.eq.s32.totalorder %v380_v14, %v2172_v3  ;;  %vm497_vm9 = vcmp.eq.s32.totalorder %v363_v15, %v2172_v3  ;;  %v362_v17 = vsub.s32 255, %v2184_v7  ;;  %v378_v18 = vsub.s32 255, %v2193_v10 }
  0x80   : > { %1213 = vmatpush.msk.msra.mxu1 %vm514_vm8, %v1865_v13  ;;  %1246 = vmatpush.msk.msra.mxu3 %vm417_vm4, %v1865_v13  ;;  %vm513_vm10 = vcmp.eq.s32.totalorder %v379_v16, %v2172_v3  ;;  %vm398_vm11 = vcmp.eq.s32.totalorder %v2196_v11, %v2172_v3  ;;  %v2239_v19 = vadd.s32 224, %v2168_v2  ;;  %v361_v20 = vsub.s32 255, %v2190_v9 }
  0x81   : > { %1231 = vmatpush.msk.msra.mxu2 %vm400_vm3, %v1865_v13  ;;  %1198 = vmatpush.msk.msra.mxu0 %vm497_vm9, %v1865_v13  ;;  %vm496_vm12 = vcmp.eq.s32.totalorder %v362_v17, %v2172_v3  ;;  %vm512_vm13 = vcmp.eq.s32.totalorder %v378_v18, %v2172_v3  ;;  %v2254_v21 = vadd.s32 80, %v2168_v2  ;;  %v2257_v22 = vadd.s32 216, %v2168_v2 }
  0x82   : > { %1214 = vmatpush.msk.msra.mxu1 %vm513_vm10, %v1865_v13  ;;  %1247 = vmatpush.msk.msra.mxu3 %vm416_vm7, %v1865_v13  ;;  %vm415_vm14 = vcmp.eq.s32.totalorder %v2239_v19, %v2172_v3  ;;  %vm2269_vm15 = vcmp.eq.s32.totalorder %v361_v20, %v2172_v3  ;;  %v377_v24 = vsub.s32 255, %v2239_v19  ;;  %v360_v25 = vsub.s32 255, %v2196_v11 }
  0x83   : > { %1232 = vmatpush.msk.msra.mxu2 %vm399_vm6, %v1865_v13  ;;  %1199 = vmatpush.msk.msra.mxu0 %vm496_vm12, %v1865_v13  ;;  %vm397_vm0 = vcmp.eq.s32.totalorder %v2254_v21, %v2172_v3  ;;  %vm414_vm1 = vcmp.eq.s32.totalorder %v2257_v22, %v2172_v3  ;;  %v376_v26 = vsub.s32 255, %v2257_v22  ;;  %v2286_v27 = vadd.s32 72, %v2168_v2 }
  0x84   : > { %1215 = vmatpush.msk.msra.mxu1 %vm512_vm13, %v1865_v13  ;;  %1248 = vmatpush.msk.msra.mxu3 %vm415_vm14, %v1865_v13  ;;  %vm511_vm2 = vcmp.eq.s32.totalorder %v377_v24, %v2172_v3  ;;  %vm2296_vm3 = vcmp.eq.s32.totalorder %v360_v25, %v2172_v3  ;;  %v2301_v29 = vadd.s32 208, %v2168_v2  ;;  %v359_v30 = vsub.s32 255, %v2254_v21 }
  0x85   : > { %1233 = vmatpush.msk.msra.mxu2 %vm398_vm11, %v1865_v13  ;;  %1200 = vmatpush.msk.msra.mxu0 %vm2269_vm15, %v1865_v13  ;;  %vm2314_vm4 = vcmp.eq.s32.totalorder %v376_v26, %v2172_v3  ;;  %vm396_vm5 = vcmp.eq.s32.totalorder %v2286_v27, %v2172_v3  ;;  %v2321_v32 = vadd.s32 64, %v2168_v2  ;;  %v2324_v33 = vadd.s32 200, %v2168_v2 }
  0x86   : > { %1216 = vmatpush.msk.msra.mxu1 %vm511_vm2, %v1865_v13  ;;  %1249 = vmatpush.msk.msra.mxu3 %vm414_vm1, %v1865_v13  ;;  %vm413_vm6 = vcmp.eq.s32.totalorder %v2301_v29, %v2172_v3  ;;  %vm2336_vm7 = vcmp.eq.s32.totalorder %v359_v30, %v2172_v3  ;;  %v375_v35 = vsub.s32 255, %v2301_v29  ;;  %v358_v36 = vsub.s32 255, %v2286_v27 }
  0x87   : > { %1234 = vmatpush.msk.msra.mxu2 %vm397_vm0, %v1865_v13  ;;  %1201 = vmatpush.msk.msra.mxu0 %vm2296_vm3, %v1865_v13  ;;  %vm395_vm8 = vcmp.eq.s32.totalorder %v2321_v32, %v2172_v3  ;;  %vm412_vm9 = vcmp.eq.s32.totalorder %v2324_v33, %v2172_v3  ;;  %v374_v37 = vsub.s32 255, %v2324_v33  ;;  %v2355_v38 = vadd.s32 56, %v2168_v2 }
  0x88   : > { %1217 = vmatpush.msk.msra.mxu1 %vm2314_vm4, %v1865_v13  ;;  %1250 = vmatpush.msk.msra.mxu3 %vm413_vm6, %v1865_v13  ;;  %vm509_vm10 = vcmp.eq.s32.totalorder %v375_v35, %v2172_v3  ;;  %vm2367_vm11 = vcmp.eq.s32.totalorder %v358_v36, %v2172_v3  ;;  %v2372_v40 = vadd.s32 192, %v2168_v2  ;;  %v357_v41 = vsub.s32 255, %v2321_v32 }
  0x89   : > { %1235 = vmatpush.msk.msra.mxu2 %vm396_vm5, %v1865_v13  ;;  %1202 = vmatpush.msk.msra.mxu0 %vm2336_vm7, %v1865_v13  ;;  %vm2385_vm12 = vcmp.eq.s32.totalorder %v374_v37, %v2172_v3  ;;  %vm394_vm13 = vcmp.eq.s32.totalorder %v2355_v38, %v2172_v3  ;;  %v2392_v43 = vadd.s32 48, %v2168_v2  ;;  %v2395_v44 = vadd.s32 184, %v2168_v2 }
  0x8a   : > { %1218 = vmatpush.msk.msra.mxu1 %vm509_vm10, %v1865_v13  ;;  %1251 = vmatpush.msk.msra.mxu3 %vm412_vm9, %v1865_v13  ;;  %vm411_vm14 = vcmp.eq.s32.totalorder %v2372_v40, %v2172_v3  ;;  %vm2407_vm15 = vcmp.eq.s32.totalorder %v357_v41, %v2172_v3  ;;  %v373_v46 = vsub.s32 255, %v2372_v40  ;;  %v356_v47 = vsub.s32 255, %v2355_v38 }
  0x8b   : > { %1236 = vmatpush.msk.msra.mxu2 %vm395_vm8, %v1865_v13  ;;  %1203 = vmatpush.msk.msra.mxu0 %vm2367_vm11, %v1865_v13  ;;  %vm393_vm0 = vcmp.eq.s32.totalorder %v2392_v43, %v2172_v3  ;;  %vm410_vm1 = vcmp.eq.s32.totalorder %v2395_v44, %v2172_v3  ;;  %v372_v48 = vsub.s32 255, %v2395_v44  ;;  %v2426_v49 = vadd.s32 40, %v2168_v2 }
  0x8c   : > { %1219 = vmatpush.msk.msra.mxu1 %vm2385_vm12, %v1865_v13  ;;  %1252 = vmatpush.msk.msra.mxu3 %vm411_vm14, %v1865_v13  ;;  %vm507_vm2 = vcmp.eq.s32.totalorder %v373_v46, %v2172_v3  ;;  %vm2438_vm3 = vcmp.eq.s32.totalorder %v356_v47, %v2172_v3  ;;  %v2443_v51 = vadd.s32 176, %v2168_v2  ;;  %v355_v52 = vsub.s32 255, %v2392_v43 }
  0x8d   : > { %1237 = vmatpush.msk.msra.mxu2 %vm394_vm13, %v1865_v13  ;;  %1204 = vmatpush.msk.msra.mxu0 %vm2407_vm15, %v1865_v13  ;;  %vm2456_vm4 = vcmp.eq.s32.totalorder %v372_v48, %v2172_v3  ;;  %vm392_vm5 = vcmp.eq.s32.totalorder %v2426_v49, %v2172_v3  ;;  %v2463_v54 = vadd.s32 32, %v2168_v2  ;;  %v2466_v55 = vadd.s32 168, %v2168_v2 }
  0x8e   : > { %1220 = vmatpush.msk.msra.mxu1 %vm507_vm2, %v1865_v13  ;;  %1253 = vmatpush.msk.msra.mxu3 %vm410_vm1, %v1865_v13  ;;  %vm409_vm6 = vcmp.eq.s32.totalorder %v2443_v51, %v2172_v3  ;;  %vm2478_vm7 = vcmp.eq.s32.totalorder %v355_v52, %v2172_v3  ;;  %v371_v57 = vsub.s32 255, %v2443_v51  ;;  %v354_v58 = vsub.s32 255, %v2426_v49 }
  0x8f   : > { %1238 = vmatpush.msk.msra.mxu2 %vm393_vm0, %v1865_v13  ;;  %1205 = vmatpush.msk.msra.mxu0 %vm2438_vm3, %v1865_v13  ;;  %vm391_vm8 = vcmp.eq.s32.totalorder %v2463_v54, %v2172_v3  ;;  %vm408_vm9 = vcmp.eq.s32.totalorder %v2466_v55, %v2172_v3  ;;  %v370_v59 = vsub.s32 255, %v2466_v55  ;;  %v2497_v60 = vadd.s32 24, %v2168_v2 }
  0x90   : > { %1221 = vmatpush.msk.msra.mxu1 %vm2456_vm4, %v1865_v13  ;;  %1254 = vmatpush.msk.msra.mxu3 %vm409_vm6, %v1865_v13  ;;  %vm505_vm10 = vcmp.eq.s32.totalorder %v371_v57, %v2172_v3  ;;  %vm2509_vm11 = vcmp.eq.s32.totalorder %v354_v58, %v2172_v3  ;;  %v2514_v62 = vadd.s32 160, %v2168_v2  ;;  %v353_v63 = vsub.s32 255, %v2463_v54 }
  0x91   : > { %1239 = vmatpush.msk.msra.mxu2 %vm392_vm5, %v1865_v13  ;;  %1206 = vmatpush.msk.msra.mxu0 %vm2478_vm7, %v1865_v13  ;;  %vm2527_vm12 = vcmp.eq.s32.totalorder %v370_v59, %v2172_v3  ;;  %vm390_vm13 = vcmp.eq.s32.totalorder %v2497_v60, %v2172_v3  ;;  %v2534_v1 = vadd.s32 16, %v2168_v2  ;;  %v2537_v23 = vadd.s32 152, %v2168_v2 }
  0x92   : > { %1222 = vmatpush.msk.msra.mxu1 %vm505_vm10, %v1865_v13  ;;  %1255 = vmatpush.msk.msra.mxu3 %vm408_vm9, %v1865_v13  ;;  %vm407_vm14 = vcmp.eq.s32.totalorder %v2514_v62, %v2172_v3  ;;  %vm2549_vm15 = vcmp.eq.s32.totalorder %v353_v63, %v2172_v3  ;;  %v369_v31 = vsub.s32 255, %v2514_v62  ;;  %v352_v34 = vsub.s32 255, %v2497_v60 }
  0x93   : > { %1240 = vmatpush.msk.msra.mxu2 %vm391_vm8, %v1865_v13  ;;  %1207 = vmatpush.msk.msra.mxu0 %vm2509_vm11, %v1865_v13  ;;  %vm389_vm0 = vcmp.eq.s32.totalorder %v2534_v1, %v2172_v3  ;;  %vm406_vm1 = vcmp.eq.s32.totalorder %v2537_v23, %v2172_v3  ;;  %v2995_v39 = vsub.s32 255, %v2537_v23  ;;  %v2568_v42 = vadd.s32 8, %v2168_v2 }
  0x94   : > { %1223 = vmatpush.msk.msra.mxu1 %vm2527_vm12, %v1865_v13  ;;  %1256 = vmatpush.msk.msra.mxu3 %vm407_vm14, %v1865_v13  ;;  %vm503_vm2 = vcmp.eq.s32.totalorder %v369_v31, %v2172_v3  ;;  %vm486_vm3 = vcmp.eq.s32.totalorder %v352_v34, %v2172_v3  ;;  %v2581_v45 = vadd.s32 144, %v2168_v2  ;;  %v2996_v50 = vsub.s32 255, %v2534_v1 }
  0x95   : > { %1241 = vmatpush.msk.msra.mxu2 %vm390_vm13, %v1865_v13  ;;  %1208 = vmatpush.msk.msra.mxu0 %vm2549_vm15, %v1865_v13  ;;  %vm502_vm4 = vcmp.eq.s32.totalorder %v2995_v39, %v2172_v3  ;;  %v2595_v53 = vadd.s32 136, %v2168_v2  ;;  %vm388_vm5 = vcmp.eq.s32.totalorder %v2568_v42, %v2172_v3  ;;  %v350_v0 = vsub.s32 255, %v2568_v42 }
  0x96   : > { %1224 = vmatpush.msk.msra.mxu1 %vm503_vm2, %v1865_v13  ;;  %1257 = vmatpush.msk.msra.mxu3 %vm406_vm1, %v1865_v13  ;;  %vm405_vm6 = vcmp.eq.s32.totalorder %v2581_v45, %v2172_v3  ;;  %vm485_vm7 = vcmp.eq.s32.totalorder %v2996_v50, %v2172_v3  ;;  %v2997_v61 = vsub.s32 255, %v2581_v45  ;;  %v2621_v39 = vadd.s32 128, %v2168_v2 }
  0x97   : > { %1242 = vmatpush.msk.msra.mxu2 %vm389_vm0, %v1865_v13  ;;  %1209 = vmatpush.msk.msra.mxu0 %vm486_vm3, %v1865_v13  ;;  %vm404_vm8 = vcmp.eq.s32.totalorder %v2595_v53, %v2172_v3  ;;  %v366_v28 = vsub.s32 255, %v2595_v53  ;;  %vm387_vm10 = vcmp.eq.s32.totalorder %v2168_v2, %v2172_v3  ;;  %v349_v50 = vsub.s32 255, %v2168_v2 }
  0x98   : > { %1225 = vmatpush.msk.msra.mxu1 %vm502_vm4, %v1865_v13  ;;  %1258 = vmatpush.msk.msra.mxu3 %vm405_vm6, %v1865_v13  ;;  %vm501_vm9 = vcmp.eq.s32.totalorder %v2997_v61, %v2172_v3  ;;  %vm684_vm11 = vcmp.eq.s32.totalorder %v2175_v4, %v2599_v56  ;;  %vm484_vm12 = vcmp.eq.s32.totalorder %v350_v0, %v2172_v3  ;;  %v365_v61 = vsub.s32 255, %v2621_v39  ;;  %v382_v4 = vld [vmem:[%s255_s25 + $0x8] sm:$0xff] }
  0x99   : > { %1243 = vmatpush.msk.msra.mxu2 %vm388_vm5, %v1865_v13  ;;  %1210 = vmatpush.msk.msra.mxu0 %vm485_vm7, %v1865_v13  ;;  %vm500_vm13 = vcmp.eq.s32.totalorder %v366_v28, %v2172_v3  ;;  %vm403_vm14 = vcmp.eq.s32.totalorder %v2621_v39, %v2172_v3  ;;  %vm483_vm15 = vcmp.eq.s32.totalorder %v349_v50, %v2172_v3 }
  0x9a   : > { %1226 = vmatpush.msk.msra.mxu1 %vm501_vm9, %v1865_v13  ;;  %1259 = vmatpush.msk.msra.mxu3 %vm404_vm8, %v1865_v13  ;;  %vm683_vm0 = vcmp.eq.s32.totalorder %v2178_v5, %v2599_v56  ;;  %vm700_vm1 = vcmp.eq.s32.totalorder %v2181_v6, %v2599_v56  ;;  %vm499_vm2 = vcmp.eq.s32.totalorder %v365_v61, %v2172_v3  ;;  %v381_v3 = vld [vmem:[%s255_s25] sm:$0xff]  ;;  %v384_v6 = vld [vmem:[%s265_s24 + $0x8] sm:$0xff]  ;;  %s1394_s25 = sshll.u32 %s3062_s18, 2 }
  0x9b   : > { %1244 = vmatpush.msk.msra.mxu2 %vm387_vm10, %v1865_v13  ;;  %1211 = vmatpush.msk.msra.mxu0 %vm484_vm12, %v1865_v13  ;;  %vm780_vm3 = vcmp.eq.s32.totalorder %v364_v12, %v2599_v56  ;;  %vm796_vm4 = vcmp.eq.s32.totalorder %v380_v14, %v2599_v56  ;;  %vm682_vm5 = vcmp.eq.s32.totalorder %v2184_v7, %v2599_v56  ;;  %v383_v5 = vld [vmem:[%s265_s24] sm:$0xff]  ;;  %v3058_v7 = vsub.s32 255, %v2537_v23  ;;  %s957_s9 = sadd.s32 %s1394_s25, %s1393_s0  ;;  %s961_s24 = sshll.u32 %s2163_s10, 4  ;;  %s962_s24 = int_to_ptr.vmem [resolvable:$true] %s961_s24 }
  0x9c   : > { %1227 = vmatpush.msk.msra.mxu1 %vm500_vm13, %v1865_v13  ;;  %1260 = vmatpush.msk.msra.mxu3 %vm403_vm14, %v1865_v13  ;;  %vm699_vm6 = vcmp.eq.s32.totalorder %v2187_v8, %v2599_v56  ;;  %vm779_vm7 = vcmp.eq.s32.totalorder %v363_v15, %v2599_v56  ;;  %vm795_vm8 = vcmp.eq.s32.totalorder %v379_v16, %v2599_v56  ;;  %v3059_v8 = vsub.s32 255, %v2534_v1  ;;  %v659_v16 = vld [vmem:[%s2163_s10] sm:$0xff]  ;;  %s1395_s8 = sshll.u32 %s957_s9, 3  ;;  %s1688_s0 = scalar_lea.hbm %s3064_s5, 64 }
  0x9d   : > { %1358 = vmatpush.msk.msrb.mxu2 %vm684_vm11, %v1865_v13  ;;  %1212 = vmatpush.msk.msra.mxu0 %vm483_vm15, %v1865_v13  ;;  %vm681_vm9 = vcmp.eq.s32.totalorder %v2190_v9, %v2599_v56  ;;  %vm698_vm10 = vcmp.eq.s32.totalorder %v2193_v10, %v2599_v56  ;;  %vm778_vm11 = vcmp.eq.s32.totalorder %v362_v17, %v2599_v56  ;;  %v3060_v9 = vsub.s32 255, %v2581_v45  ;;  %s959_s15 = scalar_lea.hbm %s3063_s28, %s1395_s8 }
  0x9e   : > { %1374 = vmatpush.msk.msrb.mxu3 %vm700_vm1, %v1865_v13  ;;  %1228 = vmatpush.msk.msra.mxu1 %vm499_vm2, %v1865_v13  ;;  %vm794_vm12 = vcmp.eq.s32.totalorder %v378_v18, %v2599_v56  ;;  %vm680_vm13 = vcmp.eq.s32.totalorder %v2196_v11, %v2599_v56  ;;  %vm697_vm14 = vcmp.eq.s32.totalorder %v2239_v19, %v2599_v56  ;;  %s963_s12 = sshll.u32 %s959_s15, 4  ;;  %s964_s12 = int_to_ptr.hbm [resolvable:$true] %s963_s12 }
  0x9f   : > { %1359 = vmatpush.msk.msrb.mxu2 %vm683_vm0, %v1865_v13  ;;  %1326 = vmatpush.msk.msrb.mxu0 %vm780_vm3, %v1865_v13  ;;  %vm777_vm15 = vcmp.eq.s32.totalorder %v361_v20, %v2599_v56  ;;  %vm793_vm0 = vcmp.eq.s32.totalorder %v377_v24, %v2599_v56  ;;  %vm679_vm1 = vcmp.eq.s32.totalorder %v2254_v21, %v2599_v56  ;;  %s1682_s26 = sshra.s32 %s964_s12, 4  ;;  %s1683_s26 = int_to_ptr.hbm [resolvable:$true] %s1682_s26 }
  0xa0   : > { %1342 = vmatpush.msk.msrb.mxu1 %vm796_vm4, %v1865_v13  ;;  %1375 = vmatpush.msk.msrb.mxu3 %vm699_vm6, %v1865_v13  ;;  %vm696_vm2 = vcmp.eq.s32.totalorder %v2257_v22, %v2599_v56  ;;  %vm776_vm3 = vcmp.eq.s32.totalorder %v360_v25, %v2599_v56  ;;  %vm792_vm4 = vcmp.eq.s32.totalorder %v376_v26, %v2599_v56  ;;  %v1390_v25 = vld [vmem:[%s2163_s10 + $0x8] sm:$0xff]  ;;  %s1684_s1 = scalar_lea.hbm %s1683_s26, 16  ;;  %p1689_p5 = scmp.lt.s32.totalorder %s1683_s26, %s3064_s5 }
  0xa1   : > { %1360 = vmatpush.msk.msrb.mxu2 %vm682_vm5, %v1865_v13  ;;  %1327 = vmatpush.msk.msrb.mxu0 %vm779_vm7, %v1865_v13  ;;  %vm678_vm5 = vcmp.eq.s32.totalorder %v2286_v27, %v2599_v56  ;;  %vm695_vm6 = vcmp.eq.s32.totalorder %v2301_v29, %v2599_v56  ;;  %vm775_vm7 = vcmp.eq.s32.totalorder %v359_v30, %v2599_v56  ;;  %p1685_p4 = scmp.ne.s32.totalorder %s1683_s26, %s1684_s1  ;;  %p1690_p7 = scmp.lt.s32.totalorder %s1688_s0, %s1684_s1 }
  0xa2   : > { %1343 = vmatpush.msk.msrb.mxu1 %vm795_vm8, %v1865_v13  ;;  %1376 = vmatpush.msk.msrb.mxu3 %vm698_vm10, %v1865_v13  ;;  %vm791_vm8 = vcmp.eq.s32.totalorder %v375_v35, %v2599_v56  ;;  %vm694_vm10 = vcmp.eq.s32.totalorder %v2324_v33, %v2599_v56 }
  0xa3   : > { %1361 = vmatpush.msk.msrb.mxu2 %vm681_vm9, %v1865_v13  ;;  %1328 = vmatpush.msk.msrb.mxu0 %vm778_vm11, %v1865_v13  ;;  %vm677_vm9 = vcmp.eq.s32.totalorder %v2321_v32, %v2599_v56  ;;  %vm774_vm11 = vcmp.eq.s32.totalorder %v358_v36, %v2599_v56  ;;  %p1686_p6 = pnand %p1685_p4, %p2035_p0  ;;  %p1691_p8 = por %p1690_p7, %p1689_p5 }
  0xa4   : > { %1344 = vmatpush.msk.msrb.mxu1 %vm794_vm12, %v1865_v13  ;;  %1377 = vmatpush.msk.msrb.mxu3 %vm697_vm14, %v1865_v13  ;;  %vm790_vm12 = vcmp.eq.s32.totalorder %v374_v37, %v2599_v56  ;;  %vm693_vm14 = vcmp.eq.s32.totalorder %v2372_v40, %v2599_v56 }
  0xa5   : > { %1362 = vmatpush.msk.msrb.mxu2 %vm680_vm13, %v1865_v13  ;;  %1329 = vmatpush.msk.msrb.mxu0 %vm777_vm15, %v1865_v13  ;;  %vm676_vm13 = vcmp.eq.s32.totalorder %v2355_v38, %v2599_v56  ;;  %vm773_vm15 = vcmp.eq.s32.totalorder %v357_v41, %v2599_v56  ;;  %p1687_p11 = pneg %p1686_p6 }
  0xa6   : > { %1345 = vmatpush.msk.msrb.mxu1 %vm793_vm0, %v1865_v13  ;;  %1378 = vmatpush.msk.msrb.mxu3 %vm696_vm2, %v1865_v13  ;;  %vm789_vm0 = vcmp.eq.s32.totalorder %v373_v46, %v2599_v56  ;;  %vm692_vm2 = vcmp.eq.s32.totalorder %v2395_v44, %v2599_v56 }
  0xa7   : > { %1363 = vmatpush.msk.msrb.mxu2 %vm679_vm1, %v1865_v13  ;;  %1330 = vmatpush.msk.msrb.mxu0 %vm776_vm3, %v1865_v13  ;;  %vm675_vm1 = vcmp.eq.s32.totalorder %v2392_v43, %v2599_v56  ;;  %vm772_vm3 = vcmp.eq.s32.totalorder %v356_v47, %v2599_v56  ;;  %p1692_p10 = pnand %p1691_p8, %p1687_p11 }
  0xa8   : > { %1346 = vmatpush.msk.msrb.mxu1 %vm792_vm4, %v1865_v13  ;;  %1379 = vmatpush.msk.msrb.mxu3 %vm695_vm6, %v1865_v13  ;;  %vm788_vm4 = vcmp.eq.s32.totalorder %v372_v48, %v2599_v56  ;;  %vm691_vm6 = vcmp.eq.s32.totalorder %v2443_v51, %v2599_v56 }
  0xa9   : > { %1364 = vmatpush.msk.msrb.mxu2 %vm678_vm5, %v1865_v13  ;;  %1331 = vmatpush.msk.msrb.mxu0 %vm775_vm7, %v1865_v13  ;;  %vm674_vm5 = vcmp.eq.s32.totalorder %v2426_v49, %v2599_v56  ;;  %vm771_vm7 = vcmp.eq.s32.totalorder %v355_v52, %v2599_v56 }
  0xaa   : > { %1347 = vmatpush.msk.msrb.mxu1 %vm791_vm8, %v1865_v13  ;;  %1380 = vmatpush.msk.msrb.mxu3 %vm694_vm10, %v1865_v13  ;;  %vm787_vm8 = vcmp.eq.s32.totalorder %v371_v57, %v2599_v56  ;;  %vm690_vm10 = vcmp.eq.s32.totalorder %v2466_v55, %v2599_v56 }
  0xab   : > { %1365 = vmatpush.msk.msrb.mxu2 %vm677_vm9, %v1865_v13  ;;  %1332 = vmatpush.msk.msrb.mxu0 %vm774_vm11, %v1865_v13  ;;  %vm673_vm9 = vcmp.eq.s32.totalorder %v2463_v54, %v2599_v56  ;;  %vm770_vm11 = vcmp.eq.s32.totalorder %v354_v58, %v2599_v56 }
  0xac   : > { %1348 = vmatpush.msk.msrb.mxu1 %vm790_vm12, %v1865_v13  ;;  %1381 = vmatpush.msk.msrb.mxu3 %vm693_vm14, %v1865_v13  ;;  %vm786_vm12 = vcmp.eq.s32.totalorder %v370_v59, %v2599_v56  ;;  %vm689_vm14 = vcmp.eq.s32.totalorder %v2514_v62, %v2599_v56 }
  0xad   : > { %1366 = vmatpush.msk.msrb.mxu2 %vm676_vm13, %v1865_v13  ;;  %1333 = vmatpush.msk.msrb.mxu0 %vm773_vm15, %v1865_v13  ;;  %vm672_vm13 = vcmp.eq.s32.totalorder %v2497_v60, %v2599_v56  ;;  %vm769_vm15 = vcmp.eq.s32.totalorder %v353_v63, %v2599_v56 }
  0xae   : > { %1349 = vmatpush.msk.msrb.mxu1 %vm789_vm0, %v1865_v13  ;;  %1382 = vmatpush.msk.msrb.mxu3 %vm692_vm2, %v1865_v13  ;;  %vm785_vm0 = vcmp.eq.s32.totalorder %v369_v31, %v2599_v56  ;;  %vm688_vm2 = vcmp.eq.s32.totalorder %v2537_v23, %v2599_v56 }
  0xaf   : > { %1367 = vmatpush.msk.msrb.mxu2 %vm675_vm1, %v1865_v13  ;;  %1334 = vmatpush.msk.msrb.mxu0 %vm772_vm3, %v1865_v13  ;;  %vm671_vm1 = vcmp.eq.s32.totalorder %v2534_v1, %v2599_v56  ;;  %vm768_vm3 = vcmp.eq.s32.totalorder %v352_v34, %v2599_v56 }
  0xb0   : > { %1350 = vmatpush.msk.msrb.mxu1 %vm788_vm4, %v1865_v13  ;;  %1383 = vmatpush.msk.msrb.mxu3 %vm691_vm6, %v1865_v13  ;;  %vm784_vm4 = vcmp.eq.s32.totalorder %v3058_v7, %v2599_v56  ;;  %vm687_vm6 = vcmp.eq.s32.totalorder %v2581_v45, %v2599_v56 }
  0xb1   : > { %1368 = vmatpush.msk.msrb.mxu2 %vm674_vm5, %v1865_v13  ;;  %1335 = vmatpush.msk.msrb.mxu0 %vm771_vm7, %v1865_v13  ;;  %vm670_vm5 = vcmp.eq.s32.totalorder %v2568_v42, %v2599_v56  ;;  %vm767_vm7 = vcmp.eq.s32.totalorder %v3059_v8, %v2599_v56 }
  0xb2   : > { %1351 = vmatpush.msk.msrb.mxu1 %vm787_vm8, %v1865_v13  ;;  %1384 = vmatpush.msk.msrb.mxu3 %vm690_vm10, %v1865_v13  ;;  %vm783_vm8 = vcmp.eq.s32.totalorder %v3060_v9, %v2599_v56  ;;  %vm686_vm10 = vcmp.eq.s32.totalorder %v2595_v53, %v2599_v56 }
  0xb3   : > { %1369 = vmatpush.msk.msrb.mxu2 %vm673_vm9, %v1865_v13  ;;  %1336 = vmatpush.msk.msrb.mxu0 %vm770_vm11, %v1865_v13  ;;  %vm669_vm9 = vcmp.eq.s32.totalorder %v2168_v2, %v2599_v56  ;;  %vm766_vm11 = vcmp.eq.s32.totalorder %v350_v0, %v2599_v56 }
  0xb4   : > { %635 = vmatmul.f32.vlgmr.msra.gmra.mxu2 %v381_v3  ;;  %1352 = vmatpush.msk.msrb.mxu1 %vm786_vm12, %v1865_v13  ;;  %vm782_vm12 = vcmp.eq.s32.totalorder %v366_v28, %v2599_v56 }
  0xb5   : > { %1370 = vmatpush.msk.msrb.mxu2 %vm672_vm13, %v1865_v13  ;;  %1385 = vmatpush.msk.msrb.mxu3 %vm689_vm14, %v1865_v13  ;;  %vm685_vm13 = vcmp.eq.s32.totalorder %v2621_v39, %v2599_v56  ;;  %vm765_vm14 = vcmp.eq.s32.totalorder %v349_v50, %v2599_v56 }
  0xb6   : > { %655 = vmatmul.f32.vlgmr.msra.gmra.mxu3 %v382_v4  ;;  %1337 = vmatpush.msk.msrb.mxu0 %vm769_vm15, %v1865_v13  ;;  %vm781_vm15 = vcmp.eq.s32.totalorder %v365_v61, %v2599_v56 }
  0xb7   : > { %1353 = vmatpush.msk.msrb.mxu1 %vm785_vm0, %v1865_v13  ;;  %1371 = vmatpush.msk.msrb.mxu2 %vm671_vm1, %v1865_v13 }
  0xb8   : > { %1386 = vmatpush.msk.msrb.mxu3 %vm688_vm2, %v1865_v13  ;;  %595 = vmatmul.f32.vlgmr.msra.gmra.mxu0 %v383_v5 }
  0xb9   : > { %615 = vmatmul.f32.vlgmr.msra.gmra.mxu1 %v384_v6  ;;  %1338 = vmatpush.msk.msrb.mxu0 %vm768_vm3, %v1865_v13 }
  0xba   : > { %1354 = vmatpush.msk.msrb.mxu1 %vm784_vm4, %v1865_v13  ;;  %1372 = vmatpush.msk.msrb.mxu2 %vm670_vm5, %v1865_v13 }
  0xbb   : > { %1387 = vmatpush.msk.msrb.mxu3 %vm687_vm6, %v1865_v13  ;;  %1339 = vmatpush.msk.msrb.mxu0 %vm767_vm7, %v1865_v13 }
  0xbc   : > { %1355 = vmatpush.msk.msrb.mxu1 %vm783_vm8, %v1865_v13  ;;  %1373 = vmatpush.msk.msrb.mxu2 %vm669_vm9, %v1865_v13 }
  0xbd   : > { %1388 = vmatpush.msk.msrb.mxu3 %vm686_vm10, %v1865_v13  ;;  %917 = vmatmul.f32.vlgmr.msrb.gmra.mxu2 %v381_v3 }
  0xbe   : > { %1340 = vmatpush.msk.msrb.mxu0 %vm766_vm11, %v1865_v13  ;;  %1356 = vmatpush.msk.msrb.mxu1 %vm782_vm12, %v1865_v13 }
  0xbf   : > { %1389 = vmatpush.msk.msrb.mxu3 %vm685_vm13, %v1865_v13 }
  0xc0   : > { %937 = vmatmul.f32.vlgmr.msrb.gmra.mxu3 %v382_v4  ;;  %1341 = vmatpush.msk.msrb.mxu0 %vm765_vm14, %v1865_v13 }
  0xc1   : > { %1357 = vmatpush.msk.msrb.mxu1 %vm781_vm15, %v1865_v13  ;;  %877 = vmatmul.f32.vlgmr.msrb.gmra.mxu0 %v383_v5 }
  0xc2   : > { %897 = vmatmul.f32.vlgmr.msrb.gmra.mxu1 %v384_v6 }
 0x135   : > { %v596_v2 = vpop.f32.mrf.mxu0 }
 0x136   : > { %v616_v10 = vpop.f32.mrf.mxu1 }
 0x137   : > { %v636_v11 = vpop.f32.mrf.mxu2  ;;  %v617_v12 = vadd.f32 %v616_v10, %v596_v2 }
 0x139   : > { %v637_v14 = vadd.f32 %v636_v11, %v617_v12  ;;  %v656_v15 = vpop.f32.mrf.mxu3 }
 0x13b   : > { %v657_v17 = vadd.f32 %v656_v15, %v637_v14 }
 0x13d   : > { %v660_v18 = vadd.f32 %v659_v16, %v657_v17 }
 0x13e   : > { %v878_v13 = vpop.f32.mrf.mxu0 }
 0x13f   : > { %661 = vst [vmem:[%s2163_s10] sm:$0xff] %v660_v18  ;;  %v898_v19 = vpop.f32.mrf.mxu1 }
 0x140   : > { %v899_v20 = vadd.f32 %v898_v19, %v878_v13  ;;  %v918_v21 = vpop.f32.mrf.mxu2 }
 0x142   : > { %v919_v22 = vadd.f32 %v918_v21, %v899_v20 }
 0x143   : > { %v938_v24 = vpop.f32.mrf.mxu3 }
 0x144   : > { %v939_v26 = vadd.f32 %v938_v24, %v919_v22 }
 0x146   : > { %v943_v27 = vadd.f32 %v1390_v25, %v939_v26 }
 0x148   : > { %1391 = vst [vmem:[%s2163_s10 + $0x8] sm:$0xff] %v943_v27 }
 0x149   : > { %1695 = shalt.err (!%p1692_p10)
}
 0x14a   : > { %1404 = dma.vmem_to_hbm [thread:$0]  (%p2035_p0), %s962_s24, 256, %s964_s12, %s946_s14  }
 0x14b PF: > { %s3065_s4 = sld [smem:[#allocation13_spill]]  ;;  %p1421_p12 = scmp.ge.s32.totalorder %s1862_s30, 2 }
 0x14c   : > { %p3066_p13 = scmp.ne.s32.totalorder %s3019_s11, 0 }
 0x14e   : > { %p1417_p3 = pnand %p1421_p12, %p3066_p13 }
 0x150   : > { %p1418_p1 = pneg %p1417_p3 }
 0x151   : > { %s975_s10 = sand.u32 1, %s3065_s4  }
 0x152   : > { %s976_s8 = scalar_lea.sflag [#allocation4], %s975_s10 }
 0x153   : > { %1785 = dma.done.wait (%p1418_p1), %s976_s8, 256  }
 0x154   : > { %1787 = vsyncadd (%p1418_p1), %s976_s8, 4294967040  ;;  %s22_s30 = sadd.s32 1, %s1862_s30   ;;  %s3068_s19 = sld [smem:[#allocation14_spill]] }
 0x155   : > { %p2918_p2 = scmp.ge.s32.totalorder %s22_s30, 10   ;;  %s3069_s14 = sld [smem:[#allocation24_spill]] }
 0x156   : > { %s3070_s18 = sld [smem:[#allocation15_spill]]  ;;  %s3074_s12 = smov %s1794_s13 }
 0x157   : > { %s3071_s11 = sld [smem:[#allocation25_spill]]  ;;  %s3078_s15 = smov %s1806_s16 }
 0x158   : > { %s3072_s25 = sld [smem:[#allocation19_spill]]  ;;  %s3079_s16 = smov %s1810_s17 }
 0x159   : > { %s3073_s2 = sld [smem:[#allocation20_spill]]  ;;  %s3080_s17 = smov %s2108_s21 }
 0x15a   : > { %s3075_s28 = sld [smem:[#allocation21_spill]]  ;;  %s3076_s13 = smov %s3068_s19 }
 0x15b   : > { %s3077_s1 = sld [smem:[#allocation22_spill]]  ;;  %s3081_s19 = smov %s1822_s20 }
 0x15c   : > { %s3083_s21 = smov %s1830_s22  ;;  %s3084_s22 = smov %s1834_s23 }
 0x15d   : > { %s3082_s20 = smov %s3071_s11  ;;  %s3085_s23 = smov %s2095_s7 }
 0x15e   : > { %s3086_s24 = smov %s1850_s27  ;;  %s3087_s26 = smov %s1858_s29 }
 0x15f   : > { %s3088_s27 = smov %s3073_s2  ;;  %21 = sbr.rel (!%p2918_p2) target bundleno = 20 (0x14), region = 107 }
 0x161   : > { %s3089_s29 = smov %s3077_s1 }
 0x164   :  { %982 = vsyncpa [#allocation3], 1 }
 0x165   :  { %984 = vsyncpa [#allocation3 + $0x1], 1 }
 0x166   :  { %985 = vsyncpa [#allocation6], 1 }
 0x167   :  { %987 = vsyncpa [#allocation6 + $0x1], 1 }
 0x168   :  { %988 = vsyncpa [#allocation4], 1 }
 0x169   :  { %990 = vsyncpa [#allocation4 + $0x1], 1 }

</bundles_post_ra>
